<compile_context>
chip_gen: v6e
topology: v6e:2x2x1
jax: 0.10.0
libtpu: 0.0.40
codegen_flags: <defaults>
</compile_context>

<pallas_src>
import functools

import jax
import jax.numpy as jnp
from jax.experimental import pallas as pl
from jax.experimental.pallas import tpu as pltpu


def _round_up(x, m):
    return (x + m - 1) // m * m


def _attention_kernel(x_ref, wqkv_ref, wout_ref, bout_ref, o_ref,
                      q_scr, k_scr, v_scr, *,
                      heads, dim_head, seq_len, tq):
    """Grid = (B, NP // TQ).  Batch axis is squeezed out of x / o blocks.

    x_ref    : (NP, DIMP)              bf16  full (padded) sequence of one batch element
    wqkv_ref : (DIMP, 3*INNER)         bf16  softmax scale already folded into the Q columns
    wout_ref : (HEADS, DIM_HEAD, DIMP) bf16  head-major output projection
    bout_ref : (1, DIMP)               f32
    o_ref    : (TQ, DIMP)              f32   one query tile of the output
    q/k/v_scr: (HEADS, NP, DIM_HEAD)   bf16  persistent scratch, filled at qi == 0
    """
    qi = pl.program_id(1)
    inner = heads * dim_head
    np_seq, _ = x_ref.shape

    # ---- QKV projection: once per batch element; result persists in VMEM scratch ----
    @pl.when(qi == 0)
    def _project_qkv():
        qkv = jnp.dot(x_ref[...], wqkv_ref[...],
                      preferred_element_type=jnp.float32)            # (NP, 3*INNER) f32
        qkv = qkv.astype(jnp.bfloat16)                                # cast once, slice bf16
        # One-time head split 'n (h d) -> h n d' (static lane slices, amortized over all
        # query tiles).  The attention matmuls below are fully batched over heads.
        for h in range(heads):
            q_scr[h] = qkv[:, 0 * inner + h * dim_head:0 * inner + (h + 1) * dim_head]
            k_scr[h] = qkv[:, 1 * inner + h * dim_head:1 * inner + (h + 1) * dim_head]
            v_scr[h] = qkv[:, 2 * inner + h * dim_head:2 * inner + (h + 1) * dim_head]

    # ---- attention for one query tile, batched over heads ----
    q0 = pl.multiple_of(qi * tq, tq)
    qh = q_scr[:, pl.ds(q0, tq), :]                                   # (H, TQ, D) bf16

    s = jnp.einsum('hqd,hkd->hqk', qh, k_scr[...],
                   preferred_element_type=jnp.float32)                # (H, TQ, NP) f32
    if np_seq != seq_len:  # static at trace time: mask zero-padded key positions
        kidx = jax.lax.broadcasted_iota(jnp.int32, s.shape, 2)
        s = jnp.where(kidx < seq_len, s, -1e30)

    # softmax in f32; denominator reciprocal goes to the EUP slot
    m = jnp.max(s, axis=-1, keepdims=True)
    p = jnp.exp(s - m)
    p = p * pl.reciprocal(jnp.sum(p, axis=-1, keepdims=True), approx=True)

    ctx = jnp.einsum('hqk,hkd->hqd', p.astype(jnp.bfloat16), v_scr[...],
                     preferred_element_type=jnp.float32)              # (H, TQ, D) f32

    # Output projection:  concat_h(ctx_h) @ W_out  ==  sum_h  ctx_h @ W_out[h]
    # (batched MXU matmul + cheap major-axis reduction; no lane concatenate)
    y = jnp.einsum('hqd,hdD->hqD', ctx.astype(jnp.bfloat16), wout_ref[...],
                   preferred_element_type=jnp.float32)                # (H, TQ, DIMP) f32
    y = jnp.sum(y, axis=0) + bout_ref[0]                              # (TQ, DIMP) f32
    o_ref[...] = y.astype(o_ref.dtype)


def attention_pallas(x, w_qkv, w_out, b_out, *, heads, dim_head):
    """x: (B, N, DIM); returns (B, N, DIM) in x.dtype (mask=None, dropout=0)."""
    B, N, DIM = x.shape
    inner = heads * dim_head
    assert w_qkv.shape == (DIM, 3 * inner)
    assert w_out.shape == (inner, DIM)
    assert b_out.shape == (1, DIM)
    scale = dim_head ** (-0.5)

    # Fold the softmax scale into the Q columns of W_qkv (free at run time).
    col_scale = jnp.concatenate([jnp.full((inner,), scale, jnp.float32),
                                 jnp.ones((2 * inner,), jnp.float32)])
    w_qkv_scaled = w_qkv.astype(jnp.float32) * col_scale[None, :]

    # Lane-dense padding: feature dim -> multiple of 128.  Query tile:
    #   * N <= 256 : one tile of round_up(N, 8) rows (minimal padded-query waste)
    #   * N  > 256 : TQ = 128, sequence padded up to a multiple of 128
    DIMP = _round_up(DIM, 128)
    TQ = _round_up(N, 8) if N <= 256 else 128
    NP = _round_up(N, TQ)

    x_p = jnp.pad(x.astype(jnp.bfloat16), ((0, 0), (0, NP - N), (0, DIMP - DIM)))
    wqkv_p = jnp.pad(w_qkv_scaled.astype(jnp.bfloat16), ((0, DIMP - DIM), (0, 0)))
    # W_out reorganized head-major: (inner, DIM) -> (heads, dim_head, DIMP)
    wout_p = jnp.pad(w_out.astype(jnp.bfloat16).reshape(heads, dim_head, DIM),
                     ((0, 0), (0, 0), (0, DIMP - DIM)))
    bout_p = jnp.pad(b_out.astype(jnp.float32), ((0, 0), (0, DIMP - DIM)))

    kernel = functools.partial(_attention_kernel, heads=heads, dim_head=dim_head,
                               seq_len=N, tq=TQ)

    # Rough VMEM budget (double-buffered blocks + persistent scratch + live score block);
    # raise the scoped limit only when the default would be exceeded (large DIM / N).
    bytes_blocks = 2 * (NP * DIMP * 2 + DIMP * 3 * inner * 2
                        + heads * dim_head * DIMP * 2 + DIMP * 4 + TQ * DIMP * 4)
    bytes_scratch = 3 * heads * NP * max(dim_head, 128) * 2
    bytes_scores = 2 * heads * TQ * NP * 4
    vmem_needed = bytes_blocks + bytes_scratch + bytes_scores
    vmem_kw = {}
    if vmem_needed > 30 * 2 ** 20:
        vmem_kw["vmem_limit_bytes"] = int(min(2 * vmem_needed, 100 * 2 ** 20))

    out = pl.pallas_call(
        kernel,
        out_shape=jax.ShapeDtypeStruct((B, NP, DIMP), jnp.float32),
        grid_spec=pltpu.PrefetchScalarGridSpec(
            num_scalar_prefetch=0,
            grid=(B, NP // TQ),
            in_specs=[
                pl.BlockSpec((None, NP, DIMP), lambda b, qi: (b, 0, 0)),          # x (full seq)
                pl.BlockSpec((DIMP, 3 * inner), lambda b, qi: (0, 0)),            # W_qkv
                pl.BlockSpec((heads, dim_head, DIMP), lambda b, qi: (0, 0, 0)),   # W_out
                pl.BlockSpec((1, DIMP), lambda b, qi: (0, 0)),                    # b_out
            ],
            out_specs=pl.BlockSpec((None, TQ, DIMP), lambda b, qi: (b, qi, 0)),
            scratch_shapes=[
                pltpu.VMEM((heads, NP, dim_head), jnp.bfloat16),                  # Q
                pltpu.VMEM((heads, NP, dim_head), jnp.bfloat16),                  # K
                pltpu.VMEM((heads, NP, dim_head), jnp.bfloat16),                  # V
            ],
        ),
        compiler_params=pltpu.CompilerParams(
            dimension_semantics=("parallel", "arbitrary"), **vmem_kw),
    )(x_p, wqkv_p, wout_p, bout_p)

    return out[:, :N, :DIM].astype(x.dtype)


def attention_ref(x, w_qkv, w_out, b_out, *, heads, dim_head):
    """Pure-JAX f32 reference mirroring the PyTorch forward (mask=None, dropout=0)."""
    B, N, DIM = x.shape
    inner = heads * dim_head
    scale = dim_head ** (-0.5)
    qkv = x @ w_qkv                                         # (B, N, 3*inner)
    q, k, v = jnp.split(qkv, 3, axis=-1)

    def split_heads(t):  # 'b n (h d) -> b h n d'
        return t.reshape(B, N, heads, dim_head).transpose(0, 2, 1, 3)

    q, k, v = map(split_heads, (q, k, v))
    dots = jnp.einsum("bhid,bhjd->bhij", q, k) * scale
    attn = jax.nn.softmax(dots, axis=-1)
    out = jnp.einsum("bhij,bhjd->bhid", attn, v)
    out = out.transpose(0, 2, 1, 3).reshape(B, N, inner)    # 'b h n d -> b n (h d)'
    return out @ w_out + b_out[0]


if __name__ == "__main__":
    # Small shapes consistent with the module's forward: x is (batch, seq, dim).
    B, N, DIM = 2, 8, 32
    HEADS, DIM_HEAD = 2, 16
    INNER = HEADS * DIM_HEAD

    key = jax.random.PRNGKey(0)
    kx, kq, ko, kb = jax.random.split(key, 4)
    x = jax.random.normal(kx, (B, N, DIM), dtype=jnp.float32)
    w_qkv = jax.random.normal(kq, (DIM, 3 * INNER), dtype=jnp.float32) * (DIM ** -0.5)
    w_out = jax.random.normal(ko, (INNER, DIM), dtype=jnp.float32) * (INNER ** -0.5)
    b_out = jax.random.normal(kb, (1, DIM), dtype=jnp.float32) * 0.01

    y = attention_pallas(x, w_qkv, w_out, b_out, heads=HEADS, dim_head=DIM_HEAD)
    y = jax.block_until_ready(y)

    y_ref = attention_ref(x, w_qkv, w_out, b_out, heads=HEADS, dim_head=DIM_HEAD)
    # bf16 MXU operands (f32 accumulation) give ~1e-2-scale absolute errors on O(1) outputs.
    err = float(jnp.max(jnp.abs(y - y_ref)))
    assert err < 0.12, f"mismatch vs reference, max abs err {err}"

    print("KERNEL_OK")
</pallas_src>

<mosaic_0001>
module attributes {stable_mosaic.version = 11 : i64} {
  func.func @_attention_kernel(%arg0: i32, %arg1: i32, %arg2: memref<1x8x128xbf16, #tpu.memory_space<vmem>>, %arg3: memref<128x96xbf16, #tpu.memory_space<vmem>>, %arg4: memref<2x16x128xbf16, #tpu.memory_space<vmem>>, %arg5: memref<1x128xf32, #tpu.memory_space<vmem>>, %arg6: memref<1x8x128xf32, #tpu.memory_space<vmem>>, %arg7: memref<2x8x16xbf16, #tpu.memory_space<vmem>>, %arg8: memref<2x8x16xbf16, #tpu.memory_space<vmem>>, %arg9: memref<2x8x16xbf16, #tpu.memory_space<vmem>>) attributes {dimension_semantics = [#tpu.dimension_semantics<parallel>, #tpu.dimension_semantics<arbitrary>], iteration_bounds = array<i64: 2, 1>, scalar_prefetch = 0 : i64, scratch_operands = 3 : i64, tpu.core_type = #tpu.core_type<tc>, window_params = [{transform_indices = @transform_0, window_bounds = array<i64: 1, 8, 128>}, {pipeline_mode = #tpu.pipeline_mode<synchronous>, transform_indices = @transform_1, window_bounds = array<i64: 128, 96>}, {pipeline_mode = #tpu.pipeline_mode<synchronous>, transform_indices = @transform_2, window_bounds = array<i64: 2, 16, 128>}, {pipeline_mode = #tpu.pipeline_mode<synchronous>, transform_indices = @transform_3, window_bounds = array<i64: 1, 128>}, {transform_indices = @transform_4, window_bounds = array<i64: 1, 8, 128>}]} {
    %c0_i32 = arith.constant 0 : i32
    %0 = arith.cmpi eq, %arg1, %c0_i32 : i32
    %1 = arith.extui %0 : i1 to i32
    %c0_i32_0 = arith.constant 0 : i32
    %2 = arith.cmpi ne, %1, %c0_i32_0 : i32
    scf.if %2 {
      %c0_21 = arith.constant 0 : index
      %c0_22 = arith.constant 0 : index
      %c0_23 = arith.constant 0 : index
      %34 = vector.load %arg2[%c0_21, %c0_22, %c0_23] : memref<1x8x128xbf16, #tpu.memory_space<vmem>>, vector<1x8x128xbf16>
      %35 = vector.shape_cast %34 : vector<1x8x128xbf16> to vector<8x128xbf16>
      %c0_24 = arith.constant 0 : index
      %c0_25 = arith.constant 0 : index
      %36 = vector.load %arg3[%c0_24, %c0_25] : memref<128x96xbf16, #tpu.memory_space<vmem>>, vector<128x96xbf16>
      %cst_26 = arith.constant dense<0.000000e+00> : vector<8x96xf32>
      %37 = tpu.matmul %35, %36, %cst_26 {dimension_numbers = #tpu.dot_dimension_numbers<[1], [0], [0], [1], [0, 0, 1, 1], [], []>} : vector<8x128xbf16>, vector<128x96xbf16>, vector<8x96xf32> -> vector<8x96xf32>
      %38 = arith.truncf %37 : vector<8x96xf32> to vector<8x96xbf16>
      %39 = vector.extract_strided_slice %38 {offsets = [0, 0], sizes = [8, 16], strides = [1, 1]} : vector<8x96xbf16> to vector<8x16xbf16>
      %c0_27 = arith.constant 0 : index
      %c0_28 = arith.constant 0 : index
      %c0_29 = arith.constant 0 : index
      %40 = vector.load %arg7[%c0_27, %c0_28, %c0_29] : memref<2x8x16xbf16, #tpu.memory_space<vmem>>, vector<1x8x16xbf16>
      %41 = vector.shape_cast %40 : vector<1x8x16xbf16> to vector<8x16xbf16>
      %42 = vector.shape_cast %39 : vector<8x16xbf16> to vector<1x8x16xbf16>
      tpu.vector_store %arg7[%c0_27, %c0_28, %c0_29], %42 {strides = array<i32>} : memref<2x8x16xbf16, #tpu.memory_space<vmem>>, vector<1x8x16xbf16>,
      %43 = vector.extract_strided_slice %38 {offsets = [0, 32], sizes = [8, 16], strides = [1, 1]} : vector<8x96xbf16> to vector<8x16xbf16>
      %c0_30 = arith.constant 0 : index
      %c0_31 = arith.constant 0 : index
      %c0_32 = arith.constant 0 : index
      %44 = vector.load %arg8[%c0_30, %c0_31, %c0_32] : memref<2x8x16xbf16, #tpu.memory_space<vmem>>, vector<1x8x16xbf16>
      %45 = vector.shape_cast %44 : vector<1x8x16xbf16> to vector<8x16xbf16>
      %46 = vector.shape_cast %43 : vector<8x16xbf16> to vector<1x8x16xbf16>
      tpu.vector_store %arg8[%c0_30, %c0_31, %c0_32], %46 {strides = array<i32>} : memref<2x8x16xbf16, #tpu.memory_space<vmem>>, vector<1x8x16xbf16>,
      %47 = vector.extract_strided_slice %38 {offsets = [0, 64], sizes = [8, 16], strides = [1, 1]} : vector<8x96xbf16> to vector<8x16xbf16>
      %c0_33 = arith.constant 0 : index
      %c0_34 = arith.constant 0 : index
      %c0_35 = arith.constant 0 : index
      %48 = vector.load %arg9[%c0_33, %c0_34, %c0_35] : memref<2x8x16xbf16, #tpu.memory_space<vmem>>, vector<1x8x16xbf16>
      %49 = vector.shape_cast %48 : vector<1x8x16xbf16> to vector<8x16xbf16>
      %50 = vector.shape_cast %47 : vector<8x16xbf16> to vector<1x8x16xbf16>
      tpu.vector_store %arg9[%c0_33, %c0_34, %c0_35], %50 {strides = array<i32>} : memref<2x8x16xbf16, #tpu.memory_space<vmem>>, vector<1x8x16xbf16>,
      %51 = vector.extract_strided_slice %38 {offsets = [0, 16], sizes = [8, 16], strides = [1, 1]} : vector<8x96xbf16> to vector<8x16xbf16>
      %c1 = arith.constant 1 : index
      %c0_36 = arith.constant 0 : index
      %c0_37 = arith.constant 0 : index
      %52 = vector.load %arg7[%c1, %c0_36, %c0_37] : memref<2x8x16xbf16, #tpu.memory_space<vmem>>, vector<1x8x16xbf16>
      %53 = vector.shape_cast %52 : vector<1x8x16xbf16> to vector<8x16xbf16>
      %54 = vector.shape_cast %51 : vector<8x16xbf16> to vector<1x8x16xbf16>
      tpu.vector_store %arg7[%c1, %c0_36, %c0_37], %54 {strides = array<i32>} : memref<2x8x16xbf16, #tpu.memory_space<vmem>>, vector<1x8x16xbf16>,
      %55 = vector.extract_strided_slice %38 {offsets = [0, 48], sizes = [8, 16], strides = [1, 1]} : vector<8x96xbf16> to vector<8x16xbf16>
      %c1_38 = arith.constant 1 : index
      %c0_39 = arith.constant 0 : index
      %c0_40 = arith.constant 0 : index
      %56 = vector.load %arg8[%c1_38, %c0_39, %c0_40] : memref<2x8x16xbf16, #tpu.memory_space<vmem>>, vector<1x8x16xbf16>
      %57 = vector.shape_cast %56 : vector<1x8x16xbf16> to vector<8x16xbf16>
      %58 = vector.shape_cast %55 : vector<8x16xbf16> to vector<1x8x16xbf16>
      tpu.vector_store %arg8[%c1_38, %c0_39, %c0_40], %58 {strides = array<i32>} : memref<2x8x16xbf16, #tpu.memory_space<vmem>>, vector<1x8x16xbf16>,
      %59 = vector.extract_strided_slice %38 {offsets = [0, 80], sizes = [8, 16], strides = [1, 1]} : vector<8x96xbf16> to vector<8x16xbf16>
      %c1_41 = arith.constant 1 : index
      %c0_42 = arith.constant 0 : index
      %c0_43 = arith.constant 0 : index
      %60 = vector.load %arg9[%c1_41, %c0_42, %c0_43] : memref<2x8x16xbf16, #tpu.memory_space<vmem>>, vector<1x8x16xbf16>
      %61 = vector.shape_cast %60 : vector<1x8x16xbf16> to vector<8x16xbf16>
      %62 = vector.shape_cast %59 : vector<8x16xbf16> to vector<1x8x16xbf16>
      tpu.vector_store %arg9[%c1_41, %c0_42, %c0_43], %62 {strides = array<i32>} : memref<2x8x16xbf16, #tpu.memory_space<vmem>>, vector<1x8x16xbf16>,
    } else {
    }
    %c8_i32 = arith.constant 8 : i32
    %3 = arith.muli %arg1, %c8_i32 : i32
    %4 = tpu.assume_multiple %3, 8 : i32
    %c0 = arith.constant 0 : index
    %5 = arith.index_cast %4 : i32 to index
    %c0_1 = arith.constant 0 : index
    %6 = vector.load %arg7[%c0, %5, %c0_1] : memref<2x8x16xbf16, #tpu.memory_space<vmem>>, vector<2x8x16xbf16>
    %c0_2 = arith.constant 0 : index
    %c0_3 = arith.constant 0 : index
    %c0_4 = arith.constant 0 : index
    %7 = vector.load %arg8[%c0_2, %c0_3, %c0_4] : memref<2x8x16xbf16, #tpu.memory_space<vmem>>, vector<2x8x16xbf16>
    "tpu.trace_start"() <{level = 10 : i32, message = "hqd,hkd->hqk"}> : () -> ()
    %cst = arith.constant dense<0.000000e+00> : vector<2x8x8xf32>
    %8 = tpu.matmul %6, %7, %cst {dimension_numbers = #tpu.dot_dimension_numbers<[2], [2], [1], [1], [0, 0, 0, 1, 1, 1], [0], [0]>} : vector<2x8x16xbf16>, vector<2x8x16xbf16>, vector<2x8x8xf32> -> vector<2x8x8xf32>
    "tpu.trace_stop"() : () -> ()
    %cst_5 = arith.constant dense<0xFF800000> : vector<2x8xf32>
    %9 = vector.multi_reduction <maximumf>, %8, %cst_5 [2] : vector<2x8x8xf32> to vector<2x8xf32>
    %10 = vector.shape_cast %9 : vector<2x8xf32> to vector<2x8x1xf32>
    %11 = vector.broadcast %10 : vector<2x8x1xf32> to vector<2x8x8xf32>
    %12 = arith.subf %8, %11 : vector<2x8x8xf32>
    %13 = math.exp %12 : vector<2x8x8xf32>
    %cst_6 = arith.constant dense<0.000000e+00> : vector<2x8xf32>
    %14 = vector.multi_reduction <add>, %13, %cst_6 [2] : vector<2x8x8xf32> to vector<2x8xf32>
    %15 = vector.shape_cast %14 : vector<2x8xf32> to vector<2x8x1xf32>
    %16 = tpu.reciprocal %15 {approx = true} : vector<2x8x1xf32> -> vector<2x8x1xf32>
    %17 = vector.broadcast %16 : vector<2x8x1xf32> to vector<2x8x8xf32>
    %18 = arith.mulf %13, %17 : vector<2x8x8xf32>
    %19 = arith.truncf %18 : vector<2x8x8xf32> to vector<2x8x8xbf16>
    %c0_7 = arith.constant 0 : index
    %c0_8 = arith.constant 0 : index
    %c0_9 = arith.constant 0 : index
    %20 = vector.load %arg9[%c0_7, %c0_8, %c0_9] : memref<2x8x16xbf16, #tpu.memory_space<vmem>>, vector<2x8x16xbf16>
    "tpu.trace_start"() <{level = 10 : i32, message = "hqk,hkd->hqd"}> : () -> ()
    %cst_10 = arith.constant dense<0.000000e+00> : vector<2x8x16xf32>
    %21 = tpu.matmul %19, %20, %cst_10 {dimension_numbers = #tpu.dot_dimension_numbers<[2], [1], [1], [2], [0, 0, 0, 1, 1, 2], [0], [0]>} : vector<2x8x8xbf16>, vector<2x8x16xbf16>, vector<2x8x16xf32> -> vector<2x8x16xf32>
    "tpu.trace_stop"() : () -> ()
    %22 = arith.truncf %21 : vector<2x8x16xf32> to vector<2x8x16xbf16>
    %c0_11 = arith.constant 0 : index
    %c0_12 = arith.constant 0 : index
    %c0_13 = arith.constant 0 : index
    %23 = vector.load %arg4[%c0_11, %c0_12, %c0_13] : memref<2x16x128xbf16, #tpu.memory_space<vmem>>, vector<2x16x128xbf16>
    "tpu.trace_start"() <{level = 10 : i32, message = "hqd,hdD->hqD"}> : () -> ()
    %cst_14 = arith.constant dense<0.000000e+00> : vector<2x8x128xf32>
    %24 = tpu.matmul %22, %23, %cst_14 {dimension_numbers = #tpu.dot_dimension_numbers<[2], [1], [1], [2], [0, 0, 0, 1, 1, 2], [0], [0]>} : vector<2x8x16xbf16>, vector<2x16x128xbf16>, vector<2x8x128xf32> -> vector<2x8x128xf32>
    "tpu.trace_stop"() : () -> ()
    %cst_15 = arith.constant dense<0.000000e+00> : vector<8x128xf32>
    %25 = vector.multi_reduction <add>, %24, %cst_15 [0] : vector<2x8x128xf32> to vector<8x128xf32>
    %c0_16 = arith.constant 0 : index
    %c0_17 = arith.constant 0 : index
    %26 = vector.load %arg5[%c0_16, %c0_17] : memref<1x128xf32, #tpu.memory_space<vmem>>, vector<1x128xf32>
    %27 = vector.shape_cast %26 : vector<1x128xf32> to vector<128xf32>
    %28 = vector.shape_cast %27 : vector<128xf32> to vector<1x128xf32>
    %29 = vector.broadcast %28 : vector<1x128xf32> to vector<8x128xf32>
    %30 = arith.addf %25, %29 : vector<8x128xf32>
    %c0_18 = arith.constant 0 : index
    %c0_19 = arith.constant 0 : index
    %c0_20 = arith.constant 0 : index
    %31 = vector.load %arg6[%c0_18, %c0_19, %c0_20] : memref<1x8x128xf32, #tpu.memory_space<vmem>>, vector<1x8x128xf32>
    %32 = vector.shape_cast %31 : vector<1x8x128xf32> to vector<8x128xf32>
    %33 = vector.shape_cast %30 : vector<8x128xf32> to vector<1x8x128xf32>
    tpu.vector_store %arg6[%c0_18, %c0_19, %c0_20], %33 {strides = array<i32>} : memref<1x8x128xf32, #tpu.memory_space<vmem>>, vector<1x8x128xf32>,
    return
  }
  func.func @transform_0(%arg0: i32, %arg1: i32) -> (i32, i32, i32) {
    %c0_i32 = arith.constant 0 : i32
    %c0_i32_0 = arith.constant 0 : i32
    %c0_i32_1 = arith.constant 0 : i32
    return %arg0, %c0_i32, %c0_i32_0 : i32, i32, i32
  }
  func.func @transform_1(%arg0: i32, %arg1: i32) -> (i32, i32) {
    %c0_i32 = arith.constant 0 : i32
    %c0_i32_0 = arith.constant 0 : i32
    %c0_i32_1 = arith.constant 0 : i32
    return %c0_i32, %c0_i32_0 : i32, i32
  }
  func.func @transform_2(%arg0: i32, %arg1: i32) -> (i32, i32, i32) {
    %c0_i32 = arith.constant 0 : i32
    %c0_i32_0 = arith.constant 0 : i32
    %c0_i32_1 = arith.constant 0 : i32
    %c0_i32_2 = arith.constant 0 : i32
    return %c0_i32, %c0_i32_0, %c0_i32_1 : i32, i32, i32
  }
  func.func @transform_3(%arg0: i32, %arg1: i32) -> (i32, i32) {
    %c0_i32 = arith.constant 0 : i32
    %c0_i32_0 = arith.constant 0 : i32
    %c0_i32_1 = arith.constant 0 : i32
    return %c0_i32, %c0_i32_0 : i32, i32
  }
  func.func @transform_4(%arg0: i32, %arg1: i32) -> (i32, i32, i32) {
    %c0_i32 = arith.constant 0 : i32
    %c0_i32_0 = arith.constant 0 : i32
    return %arg0, %arg1, %c0_i32 : i32, i32, i32
  }
}

</mosaic_0001>

<bundles_post_ra>
// kernel: tpu_custom_call.1
= control target key start
LH: loop header
LB: loop body
LE: loop exit
PB: predicated region body
PF: predicated region fallthrough
CT: control target
= control target key end

     0   :  { %9 = vsyncpa [#allocation6], 0  ;;  %s1255_s0 = inlined_call_operand.vmem [shape: bf16[2,8,128], index: 0, kind: input, shape index: {}]   ;;  %s1256_s1 = inlined_call_operand.vmem [shape: bf16[128,96], index: 1, kind: input, shape index: {}]   ;;  %s1257_s2 = inlined_call_operand.vmem [shape: bf16[2,16,128], index: 2, kind: input, shape index: {}]   ;;  %s1258_s3 = inlined_call_operand.vmem [shape: f32[1,128], index: 3, kind: input, shape index: {}]   ;;  %s1259_s4 = inlined_call_operand.hbm [shape: f32[2,8,128], index: 4, kind: output, shape index: {}]  }
   0x1   :  { %11 = vsyncpa [#allocation6 + $0x1], 0  ;;  %s1065_s15 = smov 0   ;;  %s1067_s16 = smov 0  }
   0x2   :  { %s1069_s17 = smov 0   ;;  %s1071_s18 = smov 0  }
   0x3   :  { %s1073_s19 = smov 0   ;;  %s1075_s20 = smov 0  }
   0x4 LB: > { %s767_s21 = sadd.s32 4294967295, %s1030_s20   ;;  %s768_s22 = sadd.s32 4294967294, %s1030_s20   ;;  %s1030_s20 = sphi %s1075_s20, %s17_s20   ;;  %s1026_s19 = sphi %s1073_s19, %s1266_s19   ;;  %s1022_s18 = sphi %s1071_s18, %s1265_s18   ;;  %s1018_s17 = sphi %s1069_s17, %s1264_s17   ;;  %s1014_s16 = sphi %s1067_s16, %s1263_s16   ;;  %s1010_s15 = sphi %s1065_s15, %s1262_s15  }
   0x5   : > { %s29_s23 = sadd.s32 1, %s1026_s19  ;;  %s127_s24 = sadd.s32 1, %s1018_s17 }
   0x6   : > { %p31_p0 = scmp.ge.s32.totalorder %s29_s23, 2  ;;  %p137_p1 = scmp.ne.s32.totalorder %s1018_s17, %s1014_s16 }
   0x7   : > { %p138_p2 = scmp.eq.s32.totalorder %s767_s21, 1  ;;  %p143_p3 = scmp.ne.s32.totalorder %s1014_s16, %s1010_s15 }
   0x8   : > { %s1268_s23 = smov (%p31_p0, %s29_s23), 0  ;;  %p144_p5 = scmp.eq.s32.totalorder %s768_s22, 1 }
   0x9   : > { %p1105_p4 = por %p138_p2, %p137_p1  ;;  %s122_s26 = ssub.s32 %s1026_s19, %s1268_s23 }
   0xa   : > { %p771_p6 = scmp.ge.s32.totalorder %s1030_s20, 1  ;;  %p125_p7 = scmp.eq.s32.totalorder %s122_s26, 0 }
   0xb   : > { %p1112_p8 = por %p144_p5, %p143_p3  ;;  %p178_p9 = scmp.lt.s32.totalorder %s1030_s20, 3 }
   0xc   : > { %s1118_s28 = scalar_select %p125_p7, %s1018_s17, %s127_s24  }
   0xd   : > { %p179_p10 = pnand %p771_p6, %p178_p9 }
   0xe   : > { %p203_p11 = scmp.lt.s32.totalorder (!%p179_p10), %s1022_s18, 1  ;;  %s1034_s8 = smov (!%p179_p10), 112  }
   0xf   : > { %182 = sbr.rel (%p179_p10) target bundleno = 1300 (0x514), region = 36  ;;  %s1035_s9 = smov (!%p179_p10), 96  }
  0x10   : > { %s1036_s10 = smov (!%p179_p10), 80   ;;  %s1037_s11 = smov (!%p179_p10), 64  }
  0x11   : > { %s1038_s12 = smov (!%p179_p10), 48   ;;  %s200_s24 = sand.u32 (!%p179_p10), 1, %s1014_s16  }
  0x12   : > { %s793_s5 = sshll.u32 (!%p179_p10), %s1022_s18, 7 }
  0x14   : > { %v936_v0 = vld [vmem:[%s1256_s1 + $0x38] sm:$0xff]   ;;  %v1032_v1 = vmov 0.0   ;;  %v937_v2 = vld [vmem:[%s1256_s1 + $0x30] sm:$0xff]   ;;  %vm1033_vm0 = vmmov 0   ;;  %v938_v3 = vld [vmem:[%s1256_s1 + $0x28] sm:$0xff]   ;;  %s204_s21 = scalar_select %p203_p11, %s1022_s18, 1 }
  0x15   : > { %818 = vmatprep.subr.bf16.mxu0 %v1032_v1  ;;  %838 = vmatprep.subr.bf16.mxu1 %v1032_v1  ;;  %v939_v4 = vld [vmem:[%s1256_s1 + $0x20] sm:$0xff]   ;;  %v940_v5 = vld [vmem:[%s1256_s1 + $0x18] sm:$0xff]   ;;  %v941_v6 = vld [vmem:[%s1256_s1 + $0x10] sm:$0xff]   ;;  %vm318_vm1 = vcmask 125952   ;;  %vm355_vm2 = vcmask 130048   ;;  %vm448_vm3 = vcmask 64512  }
  0x16   : > { %819 = vmatpush3.bf16.msra.mxu0 %v936_v0  ;;  %834 = vmatprep.mubr.msk.bf16.mxu0 %vm1033_vm0, %v1032_v1  ;;  %v942_v7 = vld [vmem:[%s1256_s1 + $0x8] sm:$0xff]   ;;  %s773_s26 = sshll.u32 %s204_s21, 2  ;;  %v943_v8 = vld [vmem:[%s1256_s1] sm:$0xff]   ;;  %vm478_vm4 = vcmask 1043456  }
  0x17   : > { %820 = vmatprep.subr.bf16.mxu0 %v1032_v1  ;;  %840 = vmatprep.mubr.msk.bf16.mxu1 %vm1033_vm0, %v1032_v1  ;;  %s206_s7 = scalar_lea.vmem %s1255_s0, %s773_s26  ;;  %v944_v58 = vld [vmem:[%s1257_s2] sm:$0xff]   ;;  %v945_v59 = vld [vmem:[%s1257_s2 + $0x8] sm:$0xff]   ;;  %s772_s26 = sshll.u32 %s200_s24, 3 }
  0x18   : > { %v212_v9 = vld [vmem:[%s206_s7] sm:$0xf]  ;;  %s202_s6 = scalar_lea.vmem [#allocation5], %s772_s26 }
  0x19   : > { %s697_s7 = sshll.u32 %s202_s6, 4  ;;  %s1211_s7 = int_to_ptr.vmem [resolvable:$true] %s697_s7 }
  0x1a   : > { %821 = vmatpush3.bf16.msra.mxu0 %v937_v2  ;;  %s954_s18 = scalar_lea.vmem %s1211_s7, 128 }
  0x1b   : > { %822 = vmatprep.subr.bf16.mxu0 %v1032_v1  ;;  %p955_p12 = scmp.ne.s32.totalorder %s1211_s7, %s954_s18 }
  0x1d   : > { %p956_p13 = pnand %p955_p12, %p1105_p4 }
  0x1e   : > { %823 = vmatpush3.bf16.msra.mxu0 %v938_v3 }
  0x1f   : > { %824 = vmatprep.subr.bf16.mxu0 %v1032_v1  ;;  %p957_p0 = pneg %p956_p13 }
  0x22   : > { %825 = vmatpush3.bf16.msra.mxu0 %v939_v4 }
  0x23   : > { %826 = vmatprep.subr.bf16.mxu0 %v1032_v1 }
  0x26   : > { %827 = vmatpush3.bf16.msra.mxu0 %v940_v5 }
  0x27   : > { %828 = vmatprep.subr.bf16.mxu0 %v1032_v1 }
  0x2a   : > { %829 = vmatpush3.bf16.msra.mxu0 %v941_v6 }
  0x2b   : > { %830 = vmatprep.subr.bf16.mxu0 %v1032_v1 }
  0x2e   : > { %831 = vmatpush3.bf16.msra.mxu0 %v942_v7 }
  0x2f   : > { %832 = vmatprep.subr.bf16.mxu0 %v1032_v1 }
  0x32   : > { %833 = vmatpush3.bf16.msra.mxu0 %v943_v8 }
  0x33   : > { %862 = vmatprep.subr.bf16.mxu0 %v1032_v1 }
  0x35   : > { %835 = vmatmul.mubr.bf16.vlgmr.msra.gmra.mxu0 %v212_v9 }
  0x36   : > { %864 = vmatprep.mubr.msk.bf16.mxu0 %vm1033_vm0, %v1032_v1  ;;  %863 = vmatpush3.bf16.msra.mxu0 %v944_v58 }
  0xf5   : > { %v311_v10 = vpop.f32.mrf.mxu0 }
  0xf6   : > { %v317_v11 = vpack.c.bf16 %v311_v10, %v311_v10 }
  0xf7   : > { %v836_v12 = vpop.f32.mrf.mxu0 }
  0xf8   : > { %331 = vrot.lane.b32.xlu1 %v317_v11, %s1034_s8  ;;  %323 = vrot.lane.b32.xlu0 %v317_v11, %s1035_s9  ;;  %319 = vst.msk [vmem:[#allocation2] sm:$0xf] %vm318_vm1, %v317_v11 }
  0xf9   : > { %v314_v13 = vpop.f32.mrf.mxu0 }
  0xfb   : > { %v837_v14 = vpop.f32.mrf.mxu0 }
  0xfc   : > { %336 = vrot.lane.b32.xlu0 %v317_v11, %s1036_s10  ;;  %s1209_s10 = scalar_lea.hbm %s1259_s4, %s793_s5 }
  0xff   : > { %v351_v21 = vld [vmem:[#allocation2] sm:$0xf] }
 0x16a   : > { %v332_v15 = vpop.permute.xlu1 %331  ;;  %v324_v16 = vpop.permute.xlu0 %323 }
 0x16b   : > { %335 = vst.msk [vmem:[#allocation2 + $0x4] sm:$0xf] %vm318_vm1, %v332_v15  ;;  %326 = vst.msk [vmem:[#allocation3] sm:$0xf] %vm318_vm1, %v324_v16 }
 0x16e   : > { %v337_v17 = vpop.permute.xlu0 %336 }
 0x16f   : > { %340 = vst.msk [vmem:[#allocation3 + $0x4] sm:$0xf] %vm318_vm1, %v337_v17 }
 0x172   : > { %v353_v18 = vld [vmem:[#allocation3] sm:$0xf]  ;;  %v352_v23 = vld [vmem:[#allocation2 + $0x4] sm:$0xf] }
 0x173   : > { %v360_v19 = vsel %vm355_vm2, %v353_v18, 0 }
 0x174   : > { %839 = vmatpush3.bf16.xpose.msra.mxu1 %v360_v19 }
 0x175   : > { %844 = vmatprep.subr.bf16.mxu1 %v1032_v1 }
 0x176   : > { %v354_v20 = vld [vmem:[#allocation3 + $0x4] sm:$0xf] }
 0x177   : > { %v406_v22 = vsel %vm355_vm2, %v354_v20, 0 }
 0x17b   : > { %841 = vmatmul.mubr.msk.bf16.vlgmr.msra.gmra.mxu1 %vm355_vm2, %v351_v21 }
 0x17c   : > { %845 = vmatpush3.bf16.xpose.msra.mxu1 %v406_v22  ;;  %846 = vmatprep.mubr.msk.bf16.mxu1 %vm1033_vm0, %v1032_v1 }
 0x17d   : > { %850 = vmatprep.subr.bf16.mxu1 %v1032_v1 }
 0x183   : > { %847 = vmatmul.mubr.msk.bf16.vlgmr.msra.gmra.mxu1 %vm355_vm2, %v352_v23 }
 0x184   : > { %852 = vmatprep.mubr.msk.bf16.mxu1 %vm1033_vm0, %v1032_v1 }
 0x23b   : > { %v396_v24 = vpop.f32.mrf.mxu1 }
 0x23c   : > { %v449_v25 = vsel %vm448_vm3, %v396_v24, -inf }
 0x23d   : > { %450 = vmax.xlane.f32.xlu1 %v449_v25  ;;  %v842_v26 = vpop.f32.mrf.mxu1 }
 0x23f   : > { %v399_v27 = vpop.f32.mrf.mxu1 }
 0x241   : > { %v843_v28 = vpop.f32.mrf.mxu1 }
 0x243   : > { %v442_v29 = vpop.f32.mrf.mxu1 }
 0x244   : > { %v452_v30 = vsel %vm448_vm3, %v442_v29, -inf }
 0x245   : > { %453 = vmax.xlane.f32.xlu0 %v452_v30  ;;  %v848_v31 = vpop.f32.mrf.mxu1 }
 0x247   : > { %v445_v32 = vpop.f32.mrf.mxu1 }
 0x249   : > { %v849_v33 = vpop.f32.mrf.mxu1 }
 0x2c6   : > { %v451_v34 = vpop.xlane.xlu1 %450 }
 0x2c7   : > { %v455_v35 = vsub.f32 %v396_v24, %v451_v34 }
 0x2c9   : > { %v457_v36 = vmul.f32 1.442695, %v455_v35 }
 0x2cb   : > { %946 = vpow2.f32 %v457_v36 }
 0x2ce   : > { %v454_v37 = vpop.xlane.xlu0 %453 }
 0x2cf   : > { %v456_v38 = vsub.f32 %v442_v29, %v454_v37 }
 0x2d1   : > { %v459_v39 = vmul.f32 1.442695, %v456_v38 }
 0x2d3   : > { %948 = vpow2.f32 %v459_v39 }
 0x2d8   : > { %v947_v40 = vpop.eup %946 }
 0x2d9   : > { %v461_v41 = vsel %vm448_vm3, %v947_v40, 0.0 }
 0x2da   : > { %462 = vadd.xlane.f32.xlu0 %v461_v41 }
 0x2e0   : > { %v949_v42 = vpop.eup %948 }
 0x2e1   : > { %v464_v43 = vsel %vm448_vm3, %v949_v42, 0.0 }
 0x2e2   : > { %465 = vadd.xlane.f32.xlu1 %v464_v43 }
 0x2f0   : > { %327 = vrot.lane.b32.xlu0 %v317_v11, %s1037_s11  ;;  %s683_s11 = scalar_lea.sflag [#allocation6], %s200_s24 }
 0x2f3   : > { %341 = vrot.lane.b32.xlu1 %v317_v11, %s1038_s12  ;;  %v791_v11 = vld [vmem:[%s1258_s3] ss:$0 sm:$0xff]  ;;  %s1039_s12 = smov [#allocation5]  }
 0x2f4   : > { %s958_s13 = sshll.u32 %s1039_s12, 4  ;;  %s959_s13 = int_to_ptr.vmem [resolvable:$false] %s958_s13 }
 0x2f5   : > { %s960_s14 = scalar_lea.vmem %s959_s13, 256  ;;  %p961_p1 = scmp.lt.s32.totalorder %s1211_s7, %s959_s13 }
 0x2f6   : > { %p962_p2 = scmp.lt.s32.totalorder %s960_s14, %s954_s18 }
 0x2f8   : > { %p963_p3 = por %p962_p2, %p961_p1 }
 0x2fa   : > { %p964_p5 = pnand %p963_p3, %p957_p0 }
 0x363   : > { %v463_v44 = vpop.xlane.xlu0 %462 }
 0x364   : > { %950 = vrcp.f32 %v463_v44 }
 0x367   : > { %v328_v45 = vpop.permute.xlu0 %327 }
 0x368   : > { %330 = vst.msk [vmem:[#allocation4] sm:$0xf] %vm318_vm1, %v328_v45 }
 0x36b   : > { %v466_v46 = vpop.xlane.xlu1 %465 }
 0x36c   : > { %952 = vrcp.f32 %v466_v46 }
 0x36f   : > { %v342_v47 = vpop.permute.xlu1 %341  ;;  %v473_v48 = vld [vmem:[#allocation4] sm:$0xf] }
 0x370   : > { %345 = vst.msk [vmem:[#allocation4 + $0x4] sm:$0xf] %vm318_vm1, %v342_v47  ;;  %v480_v49 = vsel %vm478_vm4, %v473_v48, 0 }
 0x371   : > { %v951_v50 = vpop.eup %950  ;;  %851 = vmatpush3.bf16.msra.mxu1 %v480_v49 }
 0x372   : > { %v469_v51 = vmul.f32 %v951_v50, %v947_v40  ;;  %856 = vmatprep.subr.bf16.mxu1 %v1032_v1 }
 0x374   : > { %v471_v52 = vpack.c.bf16 %v469_v51, %v469_v51 }
 0x376   : > { %853 = vmatmul.mubr.msk.bf16.vlgmr.msra.gmra.mxu1 %vm448_vm3, %v471_v52 }
 0x377   : > { %v474_v53 = vld [vmem:[#allocation4 + $0x4] sm:$0xf]  ;;  %858 = vmatprep.mubr.msk.bf16.mxu1 %vm1033_vm0, %v1032_v1 }
 0x378   : > { %v526_v54 = vsel %vm478_vm4, %v474_v53, 0 }
 0x379   : > { %v953_v55 = vpop.eup %952  ;;  %857 = vmatpush3.bf16.msra.mxu1 %v526_v54 }
 0x37a   : > { %v470_v56 = vmul.f32 %v953_v55, %v949_v42  ;;  %868 = vmatprep.subr.bf16.mxu1 %v1032_v1 }
 0x37c   : > { %v472_v57 = vpack.c.bf16 %v470_v56, %v470_v56 }
 0x37e   : > { %859 = vmatmul.mubr.msk.bf16.vlgmr.msra.gmra.mxu1 %vm448_vm3, %v472_v57 }
 0x37f   : > { %870 = vmatprep.mubr.msk.bf16.mxu1 %vm1033_vm0, %v1032_v1  ;;  %869 = vmatpush3.bf16.msra.mxu1 %v945_v59 }
 0x436   : > { %v516_v60 = vpop.f32.mrf.mxu1 }
 0x437   : > { %v568_v61 = vpack.c.bf16 %v516_v60, %v516_v60 }
 0x438   : > { %v854_v62 = vpop.f32.mrf.mxu1 }
 0x439   : > { %865 = vmatmul.mubr.msk.bf16.vlgmr.msra.gmra.mxu0 %vm355_vm2, %v568_v61 }
 0x43a   : > { %v519_v63 = vpop.f32.mrf.mxu1 }
 0x43c   : > { %v855_v0 = vpop.f32.mrf.mxu1 }
 0x43e   : > { %v562_v1 = vpop.f32.mrf.mxu1 }
 0x43f   : > { %v569_v2 = vpack.c.bf16 %v562_v1, %v562_v1 }
 0x440   : > { %v860_v3 = vpop.f32.mrf.mxu1 }
 0x441   : > { %871 = vmatmul.mubr.msk.bf16.vlgmr.msra.gmra.mxu1 %vm355_vm2, %v569_v2 }
 0x442   : > { %v565_v4 = vpop.f32.mrf.mxu1 }
 0x444   : > { %v861_v5 = vpop.f32.mrf.mxu1 }
 0x4f9   : > { %v617_v6 = vpop.f32.mrf.mxu0 }
 0x4fb   : > { %v866_v7 = vpop.f32.mrf.mxu0 }
 0x4fd   : > { %v620_v8 = vpop.f32.mrf.mxu0 }
 0x4ff   : > { %v867_v9 = vpop.f32.mrf.mxu0 }
 0x501   : > { %v666_v10 = vpop.f32.mrf.mxu1 }
 0x502   : > { %v672_v12 = vadd.f32 %v666_v10, %v617_v6 }
 0x503   : > { %v872_v13 = vpop.f32.mrf.mxu1 }
 0x504   : > { %v680_v14 = vadd.f32 %v791_v11, %v672_v12 }
 0x505   : > { %v669_v15 = vpop.f32.mrf.mxu1 }
 0x506   : > { %681 = vst [vmem:[%s202_s6] sm:$0xff] %v680_v14 }
 0x507   : > { %v873_v16 = vpop.f32.mrf.mxu1 }
 0x508   : > { %967 = shalt.err (!%p964_p5)
}
 0x509   : > { %s968_s21 = scalar_lea.hbm %s1209_s10, 128  ;;  %s972_s26 = scalar_lea.hbm %s1259_s4, 256 }
 0x50a   : > { %p969_p6 = scmp.ne.s32.totalorder %s1209_s10, %s968_s21  ;;  %p973_p10 = scmp.lt.s32.totalorder %s1209_s10, %s1259_s4 }
 0x50b   : > { %p974_p11 = scmp.lt.s32.totalorder %s972_s26, %s968_s21 }
 0x50c   : > { %p970_p7 = pnand %p969_p6, %p1105_p4 }
 0x50d   : > { %p975_p12 = por %p974_p11, %p973_p10 }
 0x50e   : > { %p971_p9 = pneg %p970_p7 }
 0x510   : > { %p976_p13 = pnand %p975_p12, %p971_p9 }
 0x512   : > { %979 = shalt.err (!%p976_p13)
}
 0x513   : > { %874 = dma.vmem_to_hbm [thread:$0]  (%p1105_p4), %s1211_s7, 128, %s1209_s10, %s683_s11  }
 0x514 PF: > { %p880_p0 = scmp.ge.s32.totalorder %s1030_s20, 2  ;;  %s709_s5 = sand.u32 1, %s1010_s15  }
 0x515   : > { %s710_s6 = scalar_lea.sflag [#allocation6], %s709_s5 }
 0x516   : > { %p877_p1 = pnand %p880_p0, %p1112_p8 }
 0x518   : > { %p878_p2 = pneg %p877_p1 }
 0x51a   : > { %1005 = dma.done.wait (%p878_p2), %s710_s6, 128  }
 0x51b   : > { %1007 = vsyncadd (%p878_p2), %s710_s6, 4294967168  ;;  %s17_s20 = sadd.s32 1, %s1030_s20   ;;  %s1262_s15 = smov %s1014_s16 }
 0x51c   : > { %p14_p3 = scmp.ge.s32.totalorder %s17_s20, 4   ;;  %s1263_s16 = smov %s1018_s17 }
 0x51d   : > { %s1264_s17 = smov %s1118_s28  ;;  %s1265_s18 = smov %s1026_s19 }
 0x51e   : > { %s1266_s19 = smov %s1268_s23  ;;  %16 = sbr.rel (!%p14_p3) target bundleno = 4 (0x4), region = 79 }
 0x523   :  { %715 = vsyncpa [#allocation6], 1 }
 0x524   :  { %717 = vsyncpa [#allocation6 + $0x1], 1 }

</bundles_post_ra>
